<compile_context>
chip_gen: v7x
topology: tpu7x:2x2x1
jax: 0.10.0
libtpu: 0.0.40
codegen_flags: <defaults>
</compile_context>

<pallas_src>
import math

import jax
import jax.numpy as jnp
from jax.experimental import pallas as pl
from jax.experimental.pallas import tpu as pltpu

LN_EPS = 1e-5  # nn.LayerNorm default


def _erf(x):
    # Abramowitz & Stegun 7.1.26 rational approximation (|abs err| < 1.5e-7).
    # TODO(synk): lax.erf has no guaranteed Mosaic lowering; exact-GELU's erf is
    # approximated to float32-level precision instead (exact divide, no approx vrcp).
    p = 0.3275911
    a1, a2, a3, a4, a5 = 0.254829592, -0.284496736, 1.421413741, -1.453152027, 1.061405429
    sgn = jnp.where(x >= 0, 1.0, -1.0)
    a = jnp.abs(x)
    t = 1.0 / (1.0 + p * a)
    poly = t * (a1 + t * (a2 + t * (a3 + t * (a4 + t * a5))))
    return sgn * (1.0 - poly * jnp.exp(-a * a))


def _gelu_exact(x):
    return 0.5 * x * (1.0 + _erf(x * 0.7071067811865476))


def _fcu_down_kernel(tok_ref, w_ref, g_ref, b_ref, cls_ref, out_ref):
    # tok_ref: (1, 1+Hs*Ws, C_in)  pooled channels-last tokens of batch b (row 0 = zeros)
    # w_ref:   (C_in, C_out)       1x1-conv weight (transposed)
    # g_ref/b_ref: (1, C_out)      LayerNorm affine
    # cls_ref: (1, 1, C_out)       x_t[:, 0] passthrough token
    # out_ref: (1, 1+Hs*Ws, C_out)
    tok = tok_ref[0]                                                     # (1+HsWs, C_in)
    # 1x1 conv (no bias) on already-pooled tokens == single MXU matmul, f32 accumulate
    z = jnp.dot(tok, w_ref[...], preferred_element_type=jnp.float32)    # (1+HsWs, C_out)
    # LayerNorm over the channel (lane) dim, biased variance like torch
    mu = jnp.mean(z, axis=-1, keepdims=True)
    var = jnp.mean((z - mu) ** 2, axis=-1, keepdims=True)
    y = (z - mu) * jax.lax.rsqrt(var + LN_EPS)
    y = y * g_ref[...] + b_ref[...]
    y = _gelu_exact(y)                                                   # nn.GELU() (exact)
    # dense, lane-aligned full-tile store; then overwrite row 0 with the cls token
    out_ref[0] = y.astype(out_ref.dtype)
    out_ref[0, 0:1, :] = cls_ref[0].astype(out_ref.dtype)


def fcu_down(x, x_t, conv_weight, ln_gamma, ln_beta, dw_stride):
    """Pallas FcuDown forward.  Returns (B, 1 + (H//s)*(W//s), C_out)."""
    B, C_in, H, W = x.shape
    C_out = conv_weight.shape[0]
    s = dw_stride
    assert H % s == 0 and W % s == 0, "spatial dims must be divisible by dw_stride"
    Hs, Ws = H // s, W // s
    HsWs = Hs * Ws

    # AvgPool2d(s, s) hoisted before the (linear) 1x1 conv, done in NCHW so the
    # layout transpose below touches a 4x-smaller tensor.
    xp = x.astype(jnp.float32).reshape(B, C_in, Hs, s, Ws, s).mean(axis=(3, 5))  # (B,C_in,Hs,Ws)
    tok = jnp.transpose(xp, (0, 2, 3, 1)).reshape(B, HsWs, C_in)                 # (B,HsWs,C_in)
    # prepend an all-zero row so the output tile (1+HsWs, C_out) is produced by one
    # dense matmul + one dense store; row 0 is overwritten with the cls token in-kernel.
    tok = jnp.concatenate([jnp.zeros((B, 1, C_in), jnp.float32), tok], axis=1)   # (B,1+HsWs,C_in)

    w_t = conv_weight.reshape(C_out, C_in).T.astype(jnp.float32)                 # (C_in, C_out)
    gamma = ln_gamma.reshape(1, C_out).astype(jnp.float32)
    beta = ln_beta.reshape(1, C_out).astype(jnp.float32)
    cls = x_t[:, 0:1, :].astype(jnp.float32)                                     # (B, 1, C_out)

    return pl.pallas_call(
        _fcu_down_kernel,
        out_shape=jax.ShapeDtypeStruct((B, 1 + HsWs, C_out), jnp.float32),
        grid=(B,),
        in_specs=[
            pl.BlockSpec((1, 1 + HsWs, C_in), lambda b: (b, 0, 0)),
            pl.BlockSpec((C_in, C_out), lambda b: (0, 0)),
            pl.BlockSpec((1, C_out), lambda b: (0, 0)),
            pl.BlockSpec((1, C_out), lambda b: (0, 0)),
            pl.BlockSpec((1, 1, C_out), lambda b: (b, 0, 0)),
        ],
        out_specs=pl.BlockSpec((1, 1 + HsWs, C_out), lambda b: (b, 0, 0)),
        compiler_params=pltpu.CompilerParams(
            dimension_semantics=("parallel",)),
    )(tok, w_t, gamma, beta, cls)


def fcu_down_reference(x, x_t, conv_weight, ln_gamma, ln_beta, dw_stride):
    """Pure-JAX reference mirroring the PyTorch forward exactly."""
    B, C_in, H, W = x.shape
    C_out = conv_weight.shape[0]
    s = dw_stride
    Hs, Ws = H // s, W // s
    w = conv_weight.reshape(C_out, C_in)
    y = jnp.einsum("oc,bchw->bohw", w, x, precision=jax.lax.Precision.HIGHEST)
    y = y.reshape(B, C_out, Hs, s, Ws, s).mean(axis=(3, 5))               # AvgPool2d(s, s)
    y = y.reshape(B, C_out, Hs * Ws).transpose(0, 2, 1)                   # (B, HsWs, C_out)
    mu = y.mean(-1, keepdims=True)
    var = ((y - mu) ** 2).mean(-1, keepdims=True)
    y = (y - mu) / jnp.sqrt(var + LN_EPS) * ln_gamma + ln_beta
    y = jax.nn.gelu(y, approximate=False)
    return jnp.concatenate([x_t[:, 0][:, None, :], y], axis=1)


if __name__ == "__main__":
    # small shapes: in_planes=32, out_planes=128 (lane-dense channel dim),
    # spatial 16x16, dw_stride=2  -> tokens (B, 1+64, 128)
    B, C_in, C_out, H, W, s = 2, 32, 128, 16, 16, 2

    key = jax.random.PRNGKey(0)
    kx, kt, kw, kg, kb = jax.random.split(key, 5)
    x = jax.random.normal(kx, (B, C_in, H, W), jnp.float32)
    x_t = jax.random.normal(kt, (B, 1 + (H // s) * (W // s), C_out), jnp.float32)
    conv_weight = jax.random.normal(kw, (C_out, C_in, 1, 1), jnp.float32) / math.sqrt(C_in)
    ln_gamma = 1.0 + 0.1 * jax.random.normal(kg, (C_out,), jnp.float32)
    ln_beta = 0.1 * jax.random.normal(kb, (C_out,), jnp.float32)

    out = fcu_down(x, x_t, conv_weight, ln_gamma, ln_beta, s)
    out = jax.block_until_ready(out)

    ref = fcu_down_reference(x, x_t, conv_weight, ln_gamma, ln_beta, s)
    assert out.shape == (B, 1 + (H // s) * (W // s), C_out), out.shape
    assert jnp.allclose(out, ref, atol=1e-3, rtol=1e-3), float(jnp.max(jnp.abs(out - ref)))
    print("KERNEL_OK")
</pallas_src>

<mosaic_0001>
module attributes {stable_mosaic.version = 11 : i64} {
  func.func @_fcu_down_kernel(%arg0: i32, %arg1: memref<1x65x32xf32, #tpu.memory_space<vmem>>, %arg2: memref<32x128xf32, #tpu.memory_space<vmem>>, %arg3: memref<1x128xf32, #tpu.memory_space<vmem>>, %arg4: memref<1x128xf32, #tpu.memory_space<vmem>>, %arg5: memref<1x1x128xf32, #tpu.memory_space<vmem>>, %arg6: memref<1x65x128xf32, #tpu.memory_space<vmem>>) attributes {dimension_semantics = [#tpu.dimension_semantics<parallel>], iteration_bounds = array<i64: 2>, scalar_prefetch = 0 : i64, scratch_operands = 0 : i64, tpu.core_type = #tpu.core_type<tc>, window_params = [{transform_indices = @transform_0, window_bounds = array<i64: 1, 65, 32>}, {pipeline_mode = #tpu.pipeline_mode<synchronous>, transform_indices = @transform_1, window_bounds = array<i64: 32, 128>}, {pipeline_mode = #tpu.pipeline_mode<synchronous>, transform_indices = @transform_2, window_bounds = array<i64: 1, 128>}, {pipeline_mode = #tpu.pipeline_mode<synchronous>, transform_indices = @transform_3, window_bounds = array<i64: 1, 128>}, {transform_indices = @transform_4, window_bounds = array<i64: 1, 1, 128>}, {transform_indices = @transform_5, window_bounds = array<i64: 1, 65, 128>}]} {
    %c0 = arith.constant 0 : index
    %c0_0 = arith.constant 0 : index
    %c0_1 = arith.constant 0 : index
    %0 = vector.load %arg1[%c0, %c0_0, %c0_1] : memref<1x65x32xf32, #tpu.memory_space<vmem>>, vector<1x65x32xf32>
    %1 = vector.shape_cast %0 : vector<1x65x32xf32> to vector<65x32xf32>
    %c0_2 = arith.constant 0 : index
    %c0_3 = arith.constant 0 : index
    %2 = vector.load %arg2[%c0_2, %c0_3] : memref<32x128xf32, #tpu.memory_space<vmem>>, vector<32x128xf32>
    %cst = arith.constant dense<0.000000e+00> : vector<65x128xf32>
    %3 = tpu.matmul %1, %2, %cst {dimension_numbers = #tpu.dot_dimension_numbers<[1], [0], [0], [1], [0, 0, 1, 1], [], []>} : vector<65x32xf32>, vector<32x128xf32>, vector<65x128xf32> -> vector<65x128xf32>
    %cst_4 = arith.constant dense<0.000000e+00> : vector<65xf32>
    %4 = vector.multi_reduction <add>, %3, %cst_4 [1] : vector<65x128xf32> to vector<65xf32>
    %5 = vector.shape_cast %4 : vector<65xf32> to vector<65x1xf32>
    %cst_5 = arith.constant 1.280000e+02 : f32
    %6 = vector.broadcast %cst_5 : f32 to vector<65x1xf32>
    %7 = arith.divf %5, %6 : vector<65x1xf32>
    %8 = vector.broadcast %7 : vector<65x1xf32> to vector<65x128xf32>
    %9 = arith.subf %3, %8 : vector<65x128xf32>
    %10 = arith.mulf %9, %9 : vector<65x128xf32>
    %cst_6 = arith.constant dense<0.000000e+00> : vector<65xf32>
    %11 = vector.multi_reduction <add>, %10, %cst_6 [1] : vector<65x128xf32> to vector<65xf32>
    %12 = vector.shape_cast %11 : vector<65xf32> to vector<65x1xf32>
    %cst_7 = arith.constant 1.280000e+02 : f32
    %13 = vector.broadcast %cst_7 : f32 to vector<65x1xf32>
    %14 = arith.divf %12, %13 : vector<65x1xf32>
    %15 = vector.broadcast %7 : vector<65x1xf32> to vector<65x128xf32>
    %16 = arith.subf %3, %15 : vector<65x128xf32>
    %cst_8 = arith.constant 9.99999974E-6 : f32
    %17 = vector.broadcast %cst_8 : f32 to vector<65x1xf32>
    %18 = arith.addf %14, %17 : vector<65x1xf32>
    %19 = math.rsqrt %18 : vector<65x1xf32>
    %20 = vector.broadcast %19 : vector<65x1xf32> to vector<65x128xf32>
    %21 = arith.mulf %16, %20 : vector<65x128xf32>
    %c0_9 = arith.constant 0 : index
    %c0_10 = arith.constant 0 : index
    %22 = vector.load %arg3[%c0_9, %c0_10] : memref<1x128xf32, #tpu.memory_space<vmem>>, vector<1x128xf32>
    %23 = vector.broadcast %22 : vector<1x128xf32> to vector<65x128xf32>
    %24 = arith.mulf %21, %23 : vector<65x128xf32>
    %c0_11 = arith.constant 0 : index
    %c0_12 = arith.constant 0 : index
    %25 = vector.load %arg4[%c0_11, %c0_12] : memref<1x128xf32, #tpu.memory_space<vmem>>, vector<1x128xf32>
    %26 = vector.broadcast %25 : vector<1x128xf32> to vector<65x128xf32>
    %27 = arith.addf %24, %26 : vector<65x128xf32>
    %cst_13 = arith.constant 5.000000e-01 : f32
    %28 = vector.broadcast %cst_13 : f32 to vector<65x128xf32>
    %29 = arith.mulf %28, %27 : vector<65x128xf32>
    %cst_14 = arith.constant 0.707106769 : f32
    %30 = vector.broadcast %cst_14 : f32 to vector<65x128xf32>
    %31 = arith.mulf %27, %30 : vector<65x128xf32>
    %cst_15 = arith.constant 0.000000e+00 : f32
    %32 = vector.broadcast %cst_15 : f32 to vector<65x128xf32>
    %33 = arith.cmpf oge, %31, %32 : vector<65x128xf32>
    %cst_16 = arith.constant 1.000000e+00 : f32
    %cst_17 = arith.constant -1.000000e+00 : f32
    %34 = vector.broadcast %cst_16 : f32 to vector<65x128xf32>
    %35 = vector.broadcast %cst_17 : f32 to vector<65x128xf32>
    %36 = arith.select %33, %34, %35 : vector<65x128xi1>, vector<65x128xf32>
    %37 = math.absf %31 : vector<65x128xf32>
    %cst_18 = arith.constant 0.327591091 : f32
    %38 = vector.broadcast %cst_18 : f32 to vector<65x128xf32>
    %39 = arith.mulf %38, %37 : vector<65x128xf32>
    %cst_19 = arith.constant 1.000000e+00 : f32
    %40 = vector.broadcast %cst_19 : f32 to vector<65x128xf32>
    %41 = arith.addf %40, %39 : vector<65x128xf32>
    %cst_20 = arith.constant 1.000000e+00 : f32
    %42 = vector.broadcast %cst_20 : f32 to vector<65x128xf32>
    %43 = arith.divf %42, %41 : vector<65x128xf32>
    %cst_21 = arith.constant 1.06140542 : f32
    %44 = vector.broadcast %cst_21 : f32 to vector<65x128xf32>
    %45 = arith.mulf %43, %44 : vector<65x128xf32>
    %cst_22 = arith.constant -1.45315206 : f32
    %46 = vector.broadcast %cst_22 : f32 to vector<65x128xf32>
    %47 = arith.addf %46, %45 : vector<65x128xf32>
    %48 = arith.mulf %43, %47 : vector<65x128xf32>
    %cst_23 = arith.constant 1.42141378 : f32
    %49 = vector.broadcast %cst_23 : f32 to vector<65x128xf32>
    %50 = arith.addf %49, %48 : vector<65x128xf32>
    %51 = arith.mulf %43, %50 : vector<65x128xf32>
    %cst_24 = arith.constant -0.284496725 : f32
    %52 = vector.broadcast %cst_24 : f32 to vector<65x128xf32>
    %53 = arith.addf %52, %51 : vector<65x128xf32>
    %54 = arith.mulf %43, %53 : vector<65x128xf32>
    %cst_25 = arith.constant 0.254829586 : f32
    %55 = vector.broadcast %cst_25 : f32 to vector<65x128xf32>
    %56 = arith.addf %55, %54 : vector<65x128xf32>
    %57 = arith.mulf %43, %56 : vector<65x128xf32>
    %cst_26 = arith.constant 0.000000e+00 : f32
    %58 = vector.broadcast %cst_26 : f32 to vector<65x128xf32>
    %59 = arith.subf %58, %37 : vector<65x128xf32>
    %60 = arith.mulf %59, %37 : vector<65x128xf32>
    %61 = math.exp %60 : vector<65x128xf32>
    %62 = arith.mulf %57, %61 : vector<65x128xf32>
    %cst_27 = arith.constant 1.000000e+00 : f32
    %63 = vector.broadcast %cst_27 : f32 to vector<65x128xf32>
    %64 = arith.subf %63, %62 : vector<65x128xf32>
    %65 = arith.mulf %36, %64 : vector<65x128xf32>
    %cst_28 = arith.constant 1.000000e+00 : f32
    %66 = vector.broadcast %cst_28 : f32 to vector<65x128xf32>
    %67 = arith.addf %66, %65 : vector<65x128xf32>
    %68 = arith.mulf %29, %67 : vector<65x128xf32>
    %c0_29 = arith.constant 0 : index
    %c0_30 = arith.constant 0 : index
    %c0_31 = arith.constant 0 : index
    %69 = vector.load %arg6[%c0_29, %c0_30, %c0_31] : memref<1x65x128xf32, #tpu.memory_space<vmem>>, vector<1x65x128xf32>
    %70 = vector.shape_cast %69 : vector<1x65x128xf32> to vector<65x128xf32>
    %71 = vector.shape_cast %68 : vector<65x128xf32> to vector<1x65x128xf32>
    tpu.vector_store %arg6[%c0_29, %c0_30, %c0_31], %71 {strides = array<i32>} : memref<1x65x128xf32, #tpu.memory_space<vmem>>, vector<1x65x128xf32>,
    %c0_32 = arith.constant 0 : index
    %c0_33 = arith.constant 0 : index
    %c0_34 = arith.constant 0 : index
    %72 = vector.load %arg5[%c0_32, %c0_33, %c0_34] : memref<1x1x128xf32, #tpu.memory_space<vmem>>, vector<1x1x128xf32>
    %73 = vector.shape_cast %72 : vector<1x1x128xf32> to vector<1x128xf32>
    %c0_35 = arith.constant 0 : index
    %c0_36 = arith.constant 0 : index
    %c0_37 = arith.constant 0 : index
    %74 = vector.load %arg6[%c0_35, %c0_36, %c0_37] : memref<1x65x128xf32, #tpu.memory_space<vmem>>, vector<1x1x128xf32>
    %75 = vector.shape_cast %74 : vector<1x1x128xf32> to vector<1x128xf32>
    %76 = vector.shape_cast %73 : vector<1x128xf32> to vector<1x1x128xf32>
    tpu.vector_store %arg6[%c0_35, %c0_36, %c0_37], %76 {strides = array<i32>} : memref<1x65x128xf32, #tpu.memory_space<vmem>>, vector<1x1x128xf32>,
    return
  }
  func.func @transform_0(%arg0: i32) -> (i32, i32, i32) {
    %c0_i32 = arith.constant 0 : i32
    %c0_i32_0 = arith.constant 0 : i32
    %c0_i32_1 = arith.constant 0 : i32
    return %arg0, %c0_i32, %c0_i32_0 : i32, i32, i32
  }
  func.func @transform_1(%arg0: i32) -> (i32, i32) {
    %c0_i32 = arith.constant 0 : i32
    %c0_i32_0 = arith.constant 0 : i32
    %c0_i32_1 = arith.constant 0 : i32
    return %c0_i32, %c0_i32_0 : i32, i32
  }
  func.func @transform_2(%arg0: i32) -> (i32, i32) {
    %c0_i32 = arith.constant 0 : i32
    %c0_i32_0 = arith.constant 0 : i32
    %c0_i32_1 = arith.constant 0 : i32
    return %c0_i32, %c0_i32_0 : i32, i32
  }
  func.func @transform_3(%arg0: i32) -> (i32, i32) {
    %c0_i32 = arith.constant 0 : i32
    %c0_i32_0 = arith.constant 0 : i32
    %c0_i32_1 = arith.constant 0 : i32
    return %c0_i32, %c0_i32_0 : i32, i32
  }
  func.func @transform_4(%arg0: i32) -> (i32, i32, i32) {
    %c0_i32 = arith.constant 0 : i32
    %c0_i32_0 = arith.constant 0 : i32
    %c0_i32_1 = arith.constant 0 : i32
    return %arg0, %c0_i32, %c0_i32_0 : i32, i32, i32
  }
  func.func @transform_5(%arg0: i32) -> (i32, i32, i32) {
    %c0_i32 = arith.constant 0 : i32
    %c0_i32_0 = arith.constant 0 : i32
    %c0_i32_1 = arith.constant 0 : i32
    return %arg0, %c0_i32, %c0_i32_0 : i32, i32, i32
  }
}

</mosaic_0001>

<bundles_post_ra>
// kernel: tpu_custom_call.1
= control target key start
LH: loop header
LB: loop body
LE: loop exit
PB: predicated region body
PF: predicated region fallthrough
CT: control target
= control target key end

     0   :  { %s1030_s18 = smov 0   ;;  %s1329_s0 = inlined_call_operand.vmem [shape: f32[2,65,32], index: 0, kind: input, shape index: {}]   ;;  %s1330_s1 = inlined_call_operand.vmem [shape: f32[32,128], index: 1, kind: input, shape index: {}]   ;;  %s1331_s2 = inlined_call_operand.vmem [shape: f32[1,128], index: 2, kind: input, shape index: {}]   ;;  %s1332_s3 = inlined_call_operand.vmem [shape: f32[1,128], index: 3, kind: input, shape index: {}]   ;;  %s1333_s4 = inlined_call_operand.vmem [shape: f32[2,1,128], index: 4, kind: input, shape index: {}]   ;;  %s1334_s5 = inlined_call_operand.vmem [shape: f32[2,65,128], index: 5, kind: output, shape index: {}]  }
   0x1 LB: > { %s843_s19 = sadd.s32 4294967295, %s994_s18   ;;  %p847_p0 = scmp.ge.s32.totalorder %s994_s18, 1  ;;  %s994_s18 = sphi %s1030_s18, %s15_s18  }
   0x2   : > { %p195_p1 = scmp.lt.s32.totalorder %s994_s18, 3 }
   0x4   : > { %p196_p2 = pnand %p847_p0, %p195_p1 }
   0x5   : > { %v248_v0 = vld [vmem:[%s1330_s1] sm:$0xff] (!%p196_p2)  ;;  %v249_v1 = vld [vmem:[%s1330_s1 + $0x8] sm:$0xff] (!%p196_p2)  ;;  %v250_v2 = vld [vmem:[%s1330_s1 + $0x10] sm:$0xff] (!%p196_p2)  ;;  %v996_v3 = vmov (!%p196_p2), 0.0|0.0   ;;  %p226_p3 = scmp.lt.s32.totalorder (!%p196_p2), %s843_s19, 1  ;;  %vm997_vm0 = vmmov (!%p196_p2), 0  }
   0x6   : > { %199 = sbr.rel (%p196_p2) target bundleno = 640 (0x280), region = 40  ;;  %911 = vmatprep.subr.bf16.mxu0 (!%p196_p2), %v996_v3  ;;  %v912_v4 = vpack.c.bf16 (!%p196_p2), %v249_v1, %v248_v0  ;;  %917 = vmatprep.subr.bf16.mxu1 (!%p196_p2), %v996_v3  ;;  %v251_v5 = vld [vmem:[%s1330_s1 + $0x18] sm:$0xff] (!%p196_p2)  ;;  %v998_v6 = vmov (!%p196_p2), 0.0   ;;  %vm252_vm1 = vcmask (!%p196_p2), 261120   ;;  %vm406_vm2 = vcmask (!%p196_p2), 1040384  }
   0x7   : > { %884 = vmatprep.mubr.msk.f32.mxu0 (!%p196_p2), %vm997_vm0, %v998_v6  ;;  %899 = vmatprep.mubr.msk.f32.mxu1 (!%p196_p2), %vm997_vm0, %v998_v6  ;;  %v915_v7 = vpack.c.bf16 (!%p196_p2), %v251_v5, %v250_v2 }
   0x8   : > { %913 = vmatpush3.bf16.msra.mxu0 (!%p196_p2), %v912_v4  ;;  %919 = vmatpush3.bf16.msra.mxu1 (!%p196_p2), %v912_v4 }
   0x9   : > { %914 = vmatprep.subr.bf16.mxu0 (!%p196_p2), %v996_v3  ;;  %918 = vmatprep.subr.bf16.mxu1 (!%p196_p2), %v996_v3 }
   0xc   : > { %916 = vmatpush3.bf16.msra.mxu0 (!%p196_p2), %v915_v7  ;;  %920 = vmatpush3.bf16.msra.mxu1 (!%p196_p2), %v915_v7 }
   0xd   : > { %s1336_s19 = smov (!%p226_p3, %s843_s19), 1 }
   0xe   : > { %s921_s28 = smul.u32 72, %s1336_s19  ;;  %s233_s13 = scalar_lea.vmem %s1333_s4, %s1336_s19 }
  0x10   : > { %s230_s6 = scalar_lea.vmem %s1329_s0, %s921_s28  ;;  %s1259_s16 = scalar_lea.vmem %s1334_s5, %s921_s28 }
  0x11   : > { %v239_v8 = vld [vmem:[%s230_s6] sm:$0xff]  ;;  %v244_v9 = vld [vmem:[%s230_s6 + $0x28] sm:$0xff]  ;;  %v245_v11 = vld [vmem:[%s230_s6 + $0x30] sm:$0xff] }
  0x12   : > { %885 = vmatmul.mubr.msk.f32.vlgmr.msra.gmra.mrb[0].mxu0 %vm252_vm1, %v239_v8  ;;  %900 = vmatmul.mubr.msk.f32.vlgmr.msra.gmra.mrb[0].mxu1 %vm252_vm1, %v244_v9  ;;  %v240_v10 = vld [vmem:[%s230_s6 + $0x8] sm:$0xff]  ;;  %v241_v12 = vld [vmem:[%s230_s6 + $0x10] sm:$0xff]  ;;  %v246_v13 = vld [vmem:[%s230_s6 + $0x38] sm:$0xff] }
  0x13   : > { %887 = vmatprep.mubr.msk.f32.mxu0 %vm997_vm0, %v998_v6  ;;  %902 = vmatprep.mubr.msk.f32.mxu1 %vm997_vm0, %v998_v6  ;;  %v242_v14 = vld [vmem:[%s230_s6 + $0x18] sm:$0xff]  ;;  %v247_v15 = vld [vmem:[%s230_s6 + $0x40] sm:$0x1] }
  0x14   : > { %v243_v16 = vld [vmem:[%s230_s6 + $0x20] sm:$0xff] }
  0x16   : > { %888 = vmatmul.mubr.msk.f32.gmra.mrb[2].mxu0 %vm252_vm1, %v240_v10  ;;  %903 = vmatmul.mubr.msk.f32.gmra.mrb[2].mxu1 %vm252_vm1, %v245_v11 }
  0x17   : > { %890 = vmatprep.mubr.msk.f32.mxu0 %vm997_vm0, %v998_v6  ;;  %905 = vmatprep.mubr.msk.f32.mxu1 %vm997_vm0, %v998_v6 }
  0x1a   : > { %891 = vmatmul.mubr.msk.f32.gmra.mrb[4].mxu0 %vm252_vm1, %v241_v12  ;;  %906 = vmatmul.mubr.msk.f32.gmra.mrb[4].mxu1 %vm252_vm1, %v246_v13 }
  0x1b   : > { %893 = vmatprep.mubr.msk.f32.mxu0 %vm997_vm0, %v998_v6  ;;  %908 = vmatprep.mubr.msk.f32.mxu1 %vm997_vm0, %v998_v6 }
  0x1e   : > { %894 = vmatmul.mubr.msk.f32.gmra.mrb[6].mxu0 %vm252_vm1, %v242_v14  ;;  %909 = vmatmul.mubr.msk.f32.gmra.mrb[6].mxu1 %vm252_vm1, %v247_v15 }
  0x1f   : > { %896 = vmatprep.mubr.msk.f32.mxu0 %vm997_vm0, %v998_v6 }
  0x22   : > { %897 = vmatmul.mubr.msk.f32.gmra.mrb[8].mxu0 %vm252_vm1, %v243_v16 }
  0xe5   : > { %v346_v17 = vpop.f32.mrb[0].mxu0  ;;  %v371_v18 = vpop.f32.mrb[0].mxu1 }
  0xe6   : > { %390 = vadd.xlane.f32.xlu0 %v346_v17  ;;  %v886_v19 = vpop.f32.mrb[1].mxu0  ;;  %v901_v20 = vpop.f32.mrb[1].mxu1 }
  0xe9   : > { %v351_v21 = vpop.f32.mrb[2].mxu0  ;;  %v376_v22 = vpop.f32.mrb[2].mxu1 }
  0xea   : > { %400 = vadd.xlane.f32.xlu0 %v371_v18  ;;  %392 = vadd.xlane.f32.xlu1 %v351_v21  ;;  %v889_v23 = vpop.f32.mrb[3].mxu0  ;;  %v904_v24 = vpop.f32.mrb[3].mxu1 }
  0xeb   : > { %v1114_v24 = vld [vmem:[%s1332_s3] ss:$0 sm:$0xff] }
  0xed   : > { %v356_v25 = vpop.f32.mrb[4].mxu0  ;;  %v381_v26 = vpop.f32.mrb[4].mxu1 }
  0xee   : > { %394 = vadd.xlane.f32.xlu1 %v356_v25  ;;  %v892_v27 = vpop.f32.mrb[5].mxu0  ;;  %v907_v28 = vpop.f32.mrb[5].mxu1 }
  0xf1   : > { %v361_v29 = vpop.f32.mrb[6].mxu0  ;;  %v386_v30 = vpop.f32.mrb[6].mxu1 }
  0xf2   : > { %396 = vadd.xlane.f32.xlu0 %v361_v29  ;;  %v895_v31 = vpop.f32.mrb[7].mxu0  ;;  %v910_v32 = vpop.f32.mrb[7].mxu1  ;;  %v407_v33 = vsel %vm406_vm2, %v386_v30, 0.0 }
  0xf5   : > { %v366_v34 = vpop.f32.mrb[8].mxu0 }
  0xf6   : > { %408 = vadd.xlane.f32.xlu0 %v407_v33  ;;  %398 = vadd.xlane.f32.xlu1 %v366_v34  ;;  %v898_v35 = vpop.f32.mrb[9].mxu0 }
  0xfa   : > { %404 = vadd.xlane.f32.xlu0 %v381_v26  ;;  %402 = vadd.xlane.f32.xlu1 %v376_v22 }
 0x173   : > { %v391_v36 = vpop.xlane.xlu0 %390 }
 0x174   : > { %v411_v37 = vmul.f32 0.0078125, %v391_v36 }
 0x176   : > { %v420_v38 = vsub.f32 %v346_v17, %v411_v37 }
 0x177   : > { %v401_v39 = vpop.xlane.xlu0 %400  ;;  %v393_v40 = vpop.xlane.xlu1 %392 }
 0x178   : > { %v416_v41 = vmul.f32 0.0078125, %v401_v39  ;;  %v412_v42 = vmul.f32 0.0078125, %v393_v40  ;;  %v429_v43 = vmul.f32 %v420_v38, %v420_v38 }
 0x17a   : > { %v425_v44 = vsub.f32 %v371_v18, %v416_v41  ;;  %438 = vadd.xlane.f32.xlu1 %v429_v43  ;;  %v1077_v45 = vsub.f32 %v351_v21, %v412_v42  ;;  %v1109_v21 = vld [vmem:[%s1331_s2] ss:$0 sm:$0xff] }
 0x17b   : > { %v395_v47 = vpop.xlane.xlu1 %394 }
 0x17c   : > { %v434_v46 = vmul.f32 %v425_v44, %v425_v44  ;;  %v430_v50 = vmul.f32 %v1077_v45, %v1077_v45  ;;  %v413_v57 = vmul.f32 0.0078125, %v395_v47 }
 0x17e   : > { %448 = vadd.xlane.f32.xlu0 %v434_v46  ;;  %v1089_v62 = vsub.f32 %v356_v25, %v413_v57 }
 0x17f   : > { %v397_v48 = vpop.xlane.xlu0 %396 }
 0x180   : > { %v414_v49 = vmul.f32 0.0078125, %v397_v48  ;;  %v431_v4 = vmul.f32 %v1089_v62, %v1089_v62 }
 0x182   : > { %v1081_v51 = vsub.f32 %v361_v29, %v414_v49  ;;  %440 = vadd.xlane.f32.xlu0 %v430_v50 }
 0x183   : > { %v409_v52 = vpop.xlane.xlu0 %408  ;;  %v399_v53 = vpop.xlane.xlu1 %398 }
 0x184   : > { %v432_v54 = vmul.f32 %v1081_v51, %v1081_v51  ;;  %v415_v63 = vmul.f32 0.0078125, %v399_v53  ;;  %v419_v2 = vmul.f32 0.0078125, %v409_v52 }
 0x186   : > { %444 = vadd.xlane.f32.xlu0 %v432_v54  ;;  %v1095_v3 = vsub.f32 %v366_v34, %v415_v63  ;;  %v1099_v5 = vsub.f32 %v386_v30, %v419_v2 }
 0x187   : > { %v405_v55 = vpop.xlane.xlu0 %404  ;;  %v403_v56 = vpop.xlane.xlu1 %402 }
 0x188   : > { %v418_v58 = vmul.f32 0.0078125, %v405_v55  ;;  %v417_v59 = vmul.f32 0.0078125, %v403_v56  ;;  %v433_v6 = vmul.f32 %v1095_v3, %v1095_v3  ;;  %v437_v7 = vmul.f32 %v1099_v5, %v1099_v5 }
 0x18a   : > { %v1085_v60 = vsub.f32 %v381_v26, %v418_v58  ;;  %v1087_v61 = vsub.f32 %v376_v22, %v417_v59  ;;  %v454_v8 = vsel %vm406_vm2, %v437_v7, 0.0 }
 0x18c   : > { %v436_v0 = vmul.f32 %v1085_v60, %v1085_v60  ;;  %v435_v1 = vmul.f32 %v1087_v61, %v1087_v61 }
 0x18e   : > { %452 = vadd.xlane.f32.xlu0 %v436_v0  ;;  %450 = vadd.xlane.f32.xlu1 %v435_v1 }
 0x192   : > { %442 = vadd.xlane.f32.xlu1 %v431_v4 }
 0x196   : > { %446 = vadd.xlane.f32.xlu1 %v433_v6 }
 0x19a   : > { %455 = vadd.xlane.f32.xlu1 %v454_v8 }
 0x207   : > { %v439_v9 = vpop.xlane.xlu1 %438 }
 0x208   : > { %v457_v10 = vmul.f32 0.0078125, %v439_v9 }
 0x20a   : > { %v466_v11 = vadd.f32 1e-05, %v457_v10 }
 0x20b   : > { %v449_v12 = vpop.xlane.xlu0 %448 }
 0x20c   : > { %934 = vrsqrt.f32 %v466_v11  ;;  %v462_v13 = vmul.f32 0.0078125, %v449_v12 }
 0x20e   : > { %v471_v14 = vadd.f32 1e-05, %v462_v13 }
 0x20f   : > { %v441_v15 = vpop.xlane.xlu0 %440 }
 0x210   : > { %936 = vrsqrt.f32 %v471_v14  ;;  %v458_v16 = vmul.f32 0.0078125, %v441_v15 }
 0x212   : > { %v467_v17 = vadd.f32 1e-05, %v458_v16 }
 0x213   : > { %v445_v18 = vpop.xlane.xlu0 %444 }
 0x214   : > { %938 = vrsqrt.f32 %v467_v17  ;;  %v460_v19 = vmul.f32 0.0078125, %v445_v18 }
 0x216   : > { %v935_v20 = vpop.eup %934  ;;  %v469_v22 = vadd.f32 1e-05, %v460_v19 }
 0x217   : > { %v484_v23 = vmul.f32 %v935_v20, %v420_v38 }
 0x218   : > { %940 = vrsqrt.f32 %v469_v22 }
 0x219   : > { %v500_v25 = vmul.f32 %v1109_v21, %v484_v23 }
 0x21a   : > { %v937_v26 = vpop.eup %936 }
 0x21b   : > { %v516_v27 = vadd.f32 %v1114_v24, %v500_v25  ;;  %v489_v28 = vmul.f32 %v937_v26, %v425_v44  ;;  %v453_v29 = vpop.xlane.xlu0 %452  ;;  %v451_v30 = vpop.xlane.xlu1 %450 }
 0x21c   : > { %v464_v31 = vmul.f32 0.0078125, %v453_v29  ;;  %v463_v32 = vmul.f32 0.0078125, %v451_v30 }
 0x21d   : > { %v1118_v33 = vmul.f32 0.70710677, %v516_v27  ;;  %v505_v34 = vmul.f32 %v1109_v21, %v489_v28  ;;  %v1157_v22 = vmul.f32 0.5, %v516_v27 }
 0x21e   : > { %v939_v35 = vpop.eup %938  ;;  %v473_v36 = vadd.f32 1e-05, %v464_v31  ;;  %v472_v37 = vadd.f32 1e-05, %v463_v32 }
 0x21f   : > { %v561_v38 = vand.u32 2147483647, %v1118_v33  ;;  %v1123_v39 = vadd.f32 %v1114_v24, %v505_v34  ;;  %v485_v40 = vmul.f32 %v939_v35, %v1077_v45  ;;  %v443_v41 = vpop.xlane.xlu1 %442  ;;  %vm543_vm3 = vcmp.ge.f32.partialorder %v1118_v33, 0.0 }
 0x220   : > { %942 = vrsqrt.f32 %v473_v36  ;;  %v459_v42 = vmul.f32 0.0078125, %v443_v41  ;;  %v999_v36 = vmov -1.0  }
 0x221   : > { %v570_v43 = vmul.f32 0.3275911, %v561_v38  ;;  %v1127_v44 = vmul.f32 0.70710677, %v1123_v39  ;;  %v501_v47 = vmul.f32 %v1109_v21, %v485_v40  ;;  %944 = vrsqrt.f32 %v472_v37 }
 0x222   : > { %v941_v46 = vpop.eup %940  ;;  %v468_v48 = vadd.f32 1e-05, %v459_v42  ;;  %v687_v63 = vsub.f32 0.0, %v561_v38  ;;  %v1177_v37 = vsel %vm543_vm3, 1.0, %v999_v36 }
 0x223   : > { %v579_v49 = vadd.f32 1.0, %v570_v43  ;;  %v566_v50 = vand.u32 2147483647, %v1127_v44  ;;  %v1132_v52 = vadd.f32 %v1114_v24, %v501_v47  ;;  %v487_v45 = vmul.f32 %v941_v46, %v1081_v51  ;;  %v447_v54 = vpop.xlane.xlu1 %446 }
 0x224   : > { %946 = vrsqrt.f32 %v468_v48  ;;  %v461_v0 = vmul.f32 0.0078125, %v447_v54  ;;  %v696_v10 = vmul.f32 %v687_v63, %v561_v38  ;;  %vm548_vm4 = vcmp.ge.f32.partialorder %v1127_v44, 0.0 }
 0x225   : > { %948 = vrcp.f32 %v579_v49  ;;  %v575_v53 = vmul.f32 0.3275911, %v566_v50  ;;  %v1136_v55 = vmul.f32 0.70710677, %v1132_v52  ;;  %v503_v56 = vmul.f32 %v1109_v21, %v487_v45 }
 0x226   : > { %v470_v13 = vadd.f32 1e-05, %v461_v0  ;;  %v692_v18 = vsub.f32 0.0, %v566_v50  ;;  %v705_v25 = vmul.f32 1.442695, %v696_v10 }
 0x227   : > { %v584_v57 = vadd.f32 1.0, %v575_v53  ;;  %v562_v58 = vand.u32 2147483647, %v1136_v55  ;;  %v1141_v59 = vadd.f32 %v1114_v24, %v503_v56  ;;  %v456_v6 = vpop.xlane.xlu1 %455  ;;  %v1193_v56 = vmul.f32 0.5, %v1123_v39 }
 0x228   : > { %v465_v16 = vmul.f32 0.0078125, %v456_v6  ;;  %v701_v31 = vmul.f32 %v692_v18, %v566_v50  ;;  %vm544_vm5 = vcmp.ge.f32.partialorder %v1136_v55, 0.0 }
 0x229   : > { %950 = vrcp.f32 %v584_v57  ;;  %v571_v51 = vmul.f32 0.3275911, %v562_v58  ;;  %v1144_v2 = vmul.f32 0.70710677, %v1141_v59  ;;  %v688_v32 = vsub.f32 0.0, %v562_v58 }
 0x22a   : > { %v943_v1 = vpop.eup %942  ;;  %v715_v33 = vmul.f32 1.442695, %v701_v31 }
 0x22b   : > { %v491_v4 = vmul.f32 %v943_v1, %v1085_v60  ;;  %v945_v7 = vpop.eup %944  ;;  %v580_v8 = vadd.f32 1.0, %v571_v51  ;;  %v564_v9 = vand.u32 2147483647, %v1144_v2  ;;  %v697_v49 = vmul.f32 %v688_v32, %v562_v58 }
 0x22c   : > { %v490_v12 = vmul.f32 %v945_v7, %v1087_v61  ;;  %vm546_vm6 = vcmp.ge.f32.partialorder %v1144_v2, 0.0 }
 0x22d   : > { %v507_v11 = vmul.f32 %v1109_v21, %v491_v4  ;;  %952 = vrcp.f32 %v580_v8  ;;  %v573_v15 = vmul.f32 0.3275911, %v564_v9  ;;  %v690_v41 = vsub.f32 0.0, %v564_v9 }
 0x22e   : > { %v947_v14 = vpop.eup %946  ;;  %v506_v19 = vmul.f32 %v1109_v21, %v490_v12  ;;  %954 = vrsqrt.f32 %v470_v13  ;;  %v1203_v4 = vsel %vm548_vm4, 1.0, %v999_v36  ;;  %v707_v10 = vmul.f32 1.442695, %v697_v49 }
 0x22f   : > { %v1150_v17 = vpop.eup %948  ;;  %v1153_v60 = vadd.f32 %v1114_v24, %v507_v11  ;;  %v486_v20 = vmul.f32 %v947_v14, %v1089_v62  ;;  %v582_v23 = vadd.f32 1.0, %v573_v15  ;;  %v474_v62 = vadd.f32 1e-05, %v465_v16 }
 0x230   : > { %v606_v61 = vmul.f32 1.0614054, %v1150_v17  ;;  %v1165_v28 = vadd.f32 %v1114_v24, %v506_v19  ;;  %v699_v7 = vmul.f32 %v690_v41, %v564_v9 }
 0x231   : > { %v1162_v26 = vmul.f32 0.70710677, %v1153_v60  ;;  %956 = vrcp.f32 %v582_v23  ;;  %v502_v30 = vmul.f32 %v1109_v21, %v486_v20 }
 0x232   : > { %v615_v29 = vadd.f32 -1.4531521, %v606_v61  ;;  %v1172_v35 = vmul.f32 0.70710677, %v1165_v28  ;;  %958 = vpow2.f32 %v705_v25  ;;  %v711_v20 = vmul.f32 1.442695, %v699_v7 }
 0x233   : > { %v1168_v27 = vpop.eup %950  ;;  %v568_v34 = vand.u32 2147483647, %v1162_v26  ;;  %v1186_v48 = vadd.f32 %v1114_v24, %v502_v30  ;;  %960 = vrsqrt.f32 %v474_v62  ;;  %vm550_vm7 = vcmp.ge.f32.partialorder %v1162_v26, 0.0 }
 0x234   : > { %v624_v38 = vmul.f32 %v1150_v17, %v615_v29  ;;  %v611_v40 = vmul.f32 1.0614054, %v1168_v27  ;;  %v1183_v43 = vand.u32 2147483647, %v1172_v35  ;;  %vm549_vm8 = vcmp.ge.f32.partialorder %v1172_v35, 0.0 }
 0x235   : > { %v577_v42 = vmul.f32 0.3275911, %v568_v34  ;;  %v1197_v63 = vmul.f32 0.70710677, %v1186_v48  ;;  %v694_v1 = vsub.f32 0.0, %v568_v34 }
 0x236   : > { %v633_v46 = vadd.f32 1.4214138, %v624_v38  ;;  %v620_v47 = vadd.f32 -1.4531521, %v611_v40  ;;  %v576_v45 = vmul.f32 0.3275911, %v1183_v43 }
 0x237   : > { %v586_v50 = vadd.f32 1.0, %v577_v42  ;;  %v1189_v53 = vpop.eup %952  ;;  %v1206_v11 = vand.u32 2147483647, %v1197_v63  ;;  %v703_v15 = vmul.f32 %v694_v1, %v568_v34  ;;  %v693_v38 = vsub.f32 0.0, %v1183_v43 }
 0x238   : > { %v642_v54 = vmul.f32 %v1150_v17, %v633_v46  ;;  %v629_v57 = vmul.f32 %v1168_v27, %v620_v47  ;;  %v607_v0 = vmul.f32 1.0614054, %v1189_v53  ;;  %v585_v58 = vadd.f32 1.0, %v576_v45  ;;  %v955_v39 = vpop.eup %954 }
 0x239   : > { %962 = vrcp.f32 %v586_v50  ;;  %v572_v16 = vmul.f32 0.3275911, %v1206_v11  ;;  %v488_v61 = vmul.f32 %v955_v39, %v1095_v3  ;;  %v719_v42 = vmul.f32 1.442695, %v703_v15 }
 0x23a   : > { %v651_v51 = vadd.f32 -0.28449672, %v642_v54  ;;  %v638_v6 = vadd.f32 1.4214138, %v629_v57  ;;  %964 = vpow2.f32 %v715_v33  ;;  %v616_v8 = vadd.f32 -1.4531521, %v607_v0 }
 0x23b   : > { %v1208_v12 = vpop.eup %956  ;;  %966 = vrcp.f32 %v585_v58  ;;  %v581_v30 = vadd.f32 1.0, %v572_v16  ;;  %v504_v34 = vmul.f32 %v1109_v21, %v488_v61  ;;  %v1226_v47 = vsel %vm544_vm5, 1.0, %v999_v36  ;;  %v777_v61 = vld [vmem:[%s233_s13] sm:$0x1] }
 0x23c   : > { %v660_v13 = vmul.f32 %v1150_v17, %v651_v51  ;;  %v647_v14 = vmul.f32 %v1168_v27, %v638_v6  ;;  %v625_v44 = vmul.f32 %v1189_v53, %v616_v8  ;;  %v609_v9 = vmul.f32 1.0614054, %v1208_v12  ;;  %v959_v23 = vpop.eup %958 }
 0x23d   : > { %968 = vpow2.f32 %v707_v10  ;;  %v961_v62 = vpop.eup %960  ;;  %v702_v55 = vmul.f32 %v693_v38, %v1183_v43  ;;  %v689_v6 = vsub.f32 0.0, %v1206_v11  ;;  %vm545_vm9 = vcmp.ge.f32.partialorder %v1197_v63, 0.0 }
 0x23e   : > { %v669_v18 = vadd.f32 0.2548296, %v660_v13  ;;  %v656_v19 = vadd.f32 -0.28449672, %v647_v14  ;;  %v634_v25 = vadd.f32 1.4214138, %v625_v44  ;;  %970 = vrcp.f32 %v581_v30 }
 0x23f   : > { %v618_v29 = vadd.f32 -1.4531521, %v609_v9  ;;  %972 = vpow2.f32 %v711_v20  ;;  %v492_v45 = vmul.f32 %v961_v62, %v1099_v5  ;;  %v717_v15 = vmul.f32 1.442695, %v702_v55 }
 0x240   : > { %v678_v31 = vmul.f32 %v1150_v17, %v669_v18  ;;  %v665_v32 = vmul.f32 %v1168_v27, %v656_v19  ;;  %v643_v40 = vmul.f32 %v1189_v53, %v634_v25  ;;  %v1229_v17 = vadd.f32 %v1114_v24, %v504_v34 }
 0x241   : > { %v627_v41 = vmul.f32 %v1208_v12, %v618_v29  ;;  %974 = vpow2.f32 %v719_v42  ;;  %v508_v14 = vmul.f32 %v1109_v21, %v492_v45  ;;  %v698_v21 = vmul.f32 %v689_v6, %v1206_v11 }
 0x242   : > { %v723_v3 = vmul.f32 %v959_v23, %v678_v31  ;;  %v674_v46 = vadd.f32 0.2548296, %v665_v32  ;;  %v652_v49 = vadd.f32 -0.28449672, %v643_v40  ;;  %976 = vpow2.f32 %v717_v15 }
 0x243   : > { %v1231_v33 = vpop.eup %962  ;;  %v636_v50 = vadd.f32 1.4214138, %v627_v41  ;;  %v1273_v38 = vadd.f32 %v1114_v24, %v508_v14  ;;  %v709_v55 = vmul.f32 1.442695, %v698_v21  ;;  %v527_v63 = vmul.f32 0.5, %v1186_v48 }
 0x244   : > { %v732_v54 = vsub.f32 1.0, %v723_v3  ;;  %v683_v57 = vmul.f32 %v1168_v27, %v674_v46  ;;  %v613_v0 = vmul.f32 1.0614054, %v1231_v33  ;;  %v965_v1 = vpop.eup %964  ;;  %v661_v58 = vmul.f32 %v1189_v53, %v652_v49 }
 0x245   : > { %v645_v51 = vmul.f32 %v1208_v12, %v636_v50  ;;  %v1240_v7 = vpop.eup %966  ;;  %v1244_v27 = vmul.f32 0.70710677, %v1229_v17 }
 0x246   : > { %v741_v5 = vmul.f32 %v732_v54, %v1177_v37  ;;  %v728_v39 = vmul.f32 %v965_v1, %v683_v57  ;;  %v622_v8 = vadd.f32 -1.4531521, %v613_v0  ;;  %v670_v43 = vadd.f32 0.2548296, %v661_v58 }
 0x247   : > { %v654_v10 = vadd.f32 -0.28449672, %v645_v51  ;;  %v612_v13 = vmul.f32 1.0614054, %v1240_v7  ;;  %v969_v16 = vpop.eup %968  ;;  %v1267_v30 = vand.u32 2147483647, %v1244_v27 }
 0x248   : > { %v750_v44 = vadd.f32 1.0, %v741_v5  ;;  %v737_v9 = vsub.f32 1.0, %v728_v39  ;;  %v631_v37 = vmul.f32 %v1231_v33, %v622_v8  ;;  %v679_v18 = vmul.f32 %v1189_v53, %v670_v43  ;;  %v1269_v62 = vpop.eup %970 }
 0x249   : > { %v663_v19 = vmul.f32 %v1208_v12, %v654_v10  ;;  %v621_v20 = vadd.f32 -1.4531521, %v612_v13  ;;  %v973_v40 = vpop.eup %972  ;;  %vm547_vm10 = vcmp.ge.f32.partialorder %v1244_v27, 0.0 }
 0x24a   : > { %v759_v23 = vmul.f32 %v750_v44, %v1157_v22  ;;  %v746_v25 = vmul.f32 %v737_v9, %v1203_v4  ;;  %v640_v29 = vadd.f32 1.4214138, %v631_v37  ;;  %v724_v31 = vmul.f32 %v969_v16, %v679_v18 }
 0x24b   : > { %v672_v32 = vadd.f32 0.2548296, %v663_v19  ;;  %v630_v53 = vmul.f32 %v1240_v7, %v621_v20  ;;  %v608_v22 = vmul.f32 1.0614054, %v1269_v62  ;;  %v574_v4 = vmul.f32 0.3275911, %v1267_v30  ;;  %v975_v45 = vpop.eup %974 }
 0x24c   : > { %768 = vst [vmem:[%s1259_s16] sm:$0xff] %v759_v23  ;;  %v755_v11 = vadd.f32 1.0, %v746_v25  ;;  %v649_v34 = vmul.f32 %v1231_v33, %v640_v29  ;;  %v733_v41 = vsub.f32 1.0, %v724_v31  ;;  %v528_v9 = vmul.f32 0.5, %v1141_v59  ;;  %v977_v20 = vpop.eup %976 }
 0x24d   : > { %778 = vst [vmem:[%s1259_s16] sm:$0x1] %v777_v61  ;;  %v681_v42 = vmul.f32 %v1208_v12, %v672_v32  ;;  %v639_v3 = vadd.f32 1.4214138, %v630_v53  ;;  %v617_v49 = vadd.f32 -1.4531521, %v608_v22  ;;  %v583_v50 = vadd.f32 1.0, %v574_v4 }
 0x24e   : > { %v764_v46 = vmul.f32 %v755_v11, %v1193_v56  ;;  %v658_v24 = vadd.f32 -0.28449672, %v649_v34  ;;  %v742_v54 = vmul.f32 %v733_v41, %v1226_v47  ;;  %v1288_v12 = vmul.f32 0.70710677, %v1273_v38 }
 0x24f   : > { %v726_v57 = vmul.f32 %v973_v40, %v681_v42  ;;  %v648_v0 = vmul.f32 %v1240_v7, %v639_v3  ;;  %v626_v58 = vmul.f32 %v1269_v62, %v617_v49  ;;  %978 = vrcp.f32 %v583_v50 }
 0x250   : > { %773 = vst [vmem:[%s1259_s16 + $0x28] sm:$0xff] %v764_v46  ;;  %v667_v1 = vmul.f32 %v1231_v33, %v658_v24  ;;  %v526_v56 = vmul.f32 0.5, %v1132_v52  ;;  %v751_v51 = vadd.f32 1.0, %v742_v54  ;;  %v555_v47 = vsel %vm546_vm6, 1.0, %v999_v36 }
 0x251   : > { %v735_v6 = vsub.f32 1.0, %v726_v57  ;;  %v657_v5 = vadd.f32 -0.28449672, %v648_v0  ;;  %v635_v8 = vadd.f32 1.4214138, %v626_v58  ;;  %980 = vpow2.f32 %v709_v55 }
 0x252   : > { %v676_v39 = vadd.f32 0.2548296, %v667_v1  ;;  %v760_v43 = vmul.f32 %v751_v51, %v526_v56  ;;  %v569_v52 = vand.u32 2147483647, %v1288_v12  ;;  %v691_v18 = vsub.f32 0.0, %v1267_v30 }
 0x253   : > { %v744_v10 = vmul.f32 %v735_v6, %v555_v47  ;;  %v666_v13 = vmul.f32 %v1240_v7, %v657_v5  ;;  %v644_v44 = vmul.f32 %v1269_v62, %v635_v8  ;;  %v559_v59 = vsel %vm550_vm7, 1.0, %v999_v36 }
 0x254   : > { %v685_v14 = vmul.f32 %v1231_v33, %v676_v39  ;;  %769 = vst [vmem:[%s1259_s16 + $0x8] sm:$0xff] %v760_v43  ;;  %v578_v19 = vmul.f32 0.3275911, %v569_v52  ;;  %v700_v53 = vmul.f32 %v691_v18, %v1267_v30  ;;  %v558_v4 = vsel %vm549_vm8, 1.0, %v999_v36 }
 0x255   : > { %v753_v37 = vadd.f32 1.0, %v744_v10  ;;  %v675_v2 = vadd.f32 0.2548296, %v666_v13  ;;  %v653_v16 = vadd.f32 -0.28449672, %v644_v44  ;;  %v531_v24 = vmul.f32 0.5, %v1165_v28 }
 0x256   : > { %v730_v15 = vmul.f32 %v975_v45, %v685_v14  ;;  %v587_v25 = vadd.f32 1.0, %v578_v19  ;;  %v713_v30 = vmul.f32 1.442695, %v700_v53  ;;  %v695_v45 = vsub.f32 0.0, %v569_v52 }
 0x257   : > { %v762_v21 = vmul.f32 %v753_v37, %v528_v9  ;;  %v684_v33 = vmul.f32 %v1240_v7, %v675_v2  ;;  %v662_v23 = vmul.f32 %v1269_v62, %v653_v16  ;;  %v532_v7 = vmul.f32 0.5, %v1153_v60 }
 0x258   : > { %v739_v61 = vsub.f32 1.0, %v730_v15  ;;  %982 = vrcp.f32 %v587_v25  ;;  %v704_v56 = vmul.f32 %v695_v45, %v569_v52  ;;  %v556_v37 = vsel %vm547_vm10, 1.0, %v999_v36 }
 0x259   : > { %771 = vst [vmem:[%s1259_s16 + $0x18] sm:$0xff] %v762_v21  ;;  %v729_v26 = vmul.f32 %v977_v20, %v684_v33  ;;  %v979_v29 = vpop.eup %978  ;;  %v671_v32 = vadd.f32 0.2548296, %v662_v23  ;;  %984 = vpow2.f32 %v713_v30  ;;  %v529_v16 = vmul.f32 0.5, %v1229_v17 }
 0x25a   : > { %v748_v31 = vmul.f32 %v739_v61, %v559_v59  ;;  %v610_v34 = vmul.f32 1.0614054, %v979_v29  ;;  %v721_v39 = vmul.f32 1.442695, %v704_v56  ;;  %vm551_vm11 = vcmp.ge.f32.partialorder %v1288_v12, 0.0 }
 0x25b   : > { %v738_v11 = vsub.f32 1.0, %v729_v26  ;;  %v680_v40 = vmul.f32 %v1269_v62, %v671_v32  ;;  %v981_v41 = vpop.eup %980  ;;  %v554_v62 = vsel %vm545_vm9, 1.0, %v999_v36  ;;  %v560_v23 = vsel %vm551_vm11, 1.0, %v999_v36 }
 0x25c   : > { %v757_v22 = vadd.f32 1.0, %v748_v31  ;;  %v619_v35 = vadd.f32 -1.4531521, %v610_v34  ;;  %986 = vpow2.f32 %v721_v39  ;;  %v533_v59 = vmul.f32 0.5, %v1273_v38 }
 0x25d   : > { %v747_v42 = vmul.f32 %v738_v11, %v558_v4  ;;  %v725_v46 = vmul.f32 %v981_v41, %v680_v40 }
 0x25e   : > { %v766_v3 = vmul.f32 %v757_v22, %v532_v7  ;;  %v628_v50 = vmul.f32 %v979_v29, %v619_v35 }
 0x25f   : > { %v756_v49 = vadd.f32 1.0, %v747_v42  ;;  %v734_v60 = vsub.f32 1.0, %v725_v46 }
 0x260   : > { %775 = vst [vmem:[%s1259_s16 + $0x38] sm:$0xff] %v766_v3  ;;  %v637_v57 = vadd.f32 1.4214138, %v628_v50 }
 0x261   : > { %v765_v54 = vmul.f32 %v756_v49, %v531_v24  ;;  %v743_v0 = vmul.f32 %v734_v60, %v554_v62 }
 0x262   : > { %v646_v55 = vmul.f32 %v979_v29, %v637_v57  ;;  %v983_v1 = vpop.eup %982 }
 0x263   : > { %774 = vst [vmem:[%s1259_s16 + $0x30] sm:$0xff] %v765_v54  ;;  %v752_v58 = vadd.f32 1.0, %v743_v0  ;;  %v614_v51 = vmul.f32 1.0614054, %v983_v1  ;;  %v985_v14 = vpop.eup %984 }
 0x264   : > { %v655_v28 = vadd.f32 -0.28449672, %v646_v55 }
 0x265   : > { %v761_v6 = vmul.f32 %v752_v58, %v527_v63  ;;  %v623_v47 = vadd.f32 -1.4531521, %v614_v51 }
 0x266   : > { %v664_v5 = vmul.f32 %v979_v29, %v655_v28  ;;  %v987_v33 = vpop.eup %986 }
 0x267   : > { %770 = vst [vmem:[%s1259_s16 + $0x10] sm:$0xff] %v761_v6  ;;  %v632_v43 = vmul.f32 %v983_v1, %v623_v47 }
 0x268   : > { %v673_v8 = vadd.f32 0.2548296, %v664_v5 }
 0x269   : > { %v641_v13 = vadd.f32 1.4214138, %v632_v43 }
 0x26a   : > { %v682_v10 = vmul.f32 %v979_v29, %v673_v8 }
 0x26b   : > { %v650_v48 = vmul.f32 %v983_v1, %v641_v13 }
 0x26c   : > { %v727_v44 = vmul.f32 %v985_v14, %v682_v10 }
 0x26d   : > { %v659_v52 = vadd.f32 -0.28449672, %v650_v48 }
 0x26e   : > { %v736_v9 = vsub.f32 1.0, %v727_v44 }
 0x26f   : > { %v668_v15 = vmul.f32 %v983_v1, %v659_v52 }
 0x270   : > { %v745_v2 = vmul.f32 %v736_v9, %v556_v37 }
 0x271   : > { %v677_v19 = vadd.f32 0.2548296, %v668_v15 }
 0x272   : > { %v754_v18 = vadd.f32 1.0, %v745_v2 }
 0x273   : > { %v686_v21 = vmul.f32 %v983_v1, %v677_v19 }
 0x274   : > { %v763_v20 = vmul.f32 %v754_v18, %v529_v16 }
 0x275   : > { %v731_v27 = vmul.f32 %v987_v33, %v686_v21 }
 0x276   : > { %772 = vst [vmem:[%s1259_s16 + $0x20] sm:$0xff] %v763_v20 }
 0x277   : > { %v740_v61 = vsub.f32 1.0, %v731_v27 }
 0x279   : > { %v749_v25 = vmul.f32 %v740_v61, %v560_v23 }
 0x27b   : > { %v758_v26 = vadd.f32 1.0, %v749_v25 }
 0x27d   : > { %v767_v29 = vmul.f32 %v758_v26, %v533_v59 }
 0x27f   : > { %776 = vst [vmem:[%s1259_s16 + $0x40] sm:$0x1] %v767_v29 }
 0x280 PF: > { %s15_s18 = sadd.s32 1, %s994_s18  }
 0x281   : > { %p12_p4 = scmp.ge.s32.totalorder %s15_s18, 4  }
 0x283   :  { %14 = sbr.rel (!%p12_p4) target bundleno = 1 (0x1), region = 73 }

</bundles_post_ra>
